<compile_context>
chip_gen: v7x
topology: tpu7x:2x2x1
jax: 0.10.0
libtpu: 0.0.40
codegen_flags: <defaults>
</compile_context>

<pallas_src>
import jax
import jax.numpy as jnp
from jax import lax
from jax.experimental import pallas as pl
from jax.experimental.pallas import tpu as pltpu

NEG_SLOPE = 0.15


def _leaky(v):
    return jnp.where(v > 0, v, NEG_SLOPE * v)


def _dot(a, b):
    return jnp.dot(a, b, preferred_element_type=jnp.float32)


def _round_up(v, m):
    return ((v + m - 1) // m) * m


# ---------------------------------------------------------------------------
# Pass 1: fused edge MLP for both conv layers, edge-tiled.
# Output column layout (hpad = round_up(2H+1, 128)):
#   col 0         : 1.0                       (degree / ones column)
#   cols 1..H     : leaky(ea @ c1_ew1 + c1_eb1)
#   cols H+1..2H  : leaky(ea @ c2_ew1 + c2_eb1)
#   rest          : 0
# Ones/zero columns come for free from zero-padded weights + bias
# (leaky(1) = 1, leaky(0) = 0), so the kernel is one matmul + leaky + cast.
def edge_mlp_kernel(ea_ref, w_ref, b_ref, h_ref):
    h = _leaky(_dot(ea_ref[...], w_ref[...]) + b_ref[...])
    h_ref[...] = h.astype(jnp.bfloat16)


# ---------------------------------------------------------------------------
# Pass 2: scatter-add over dst-sorted edges + node update + mu/logvar head.
def edge_vgae_kernel(
    off_ref, cnt_ref,                       # scalar prefetch (SMEM)
    x_ref, h_ref, dst_ref,
    c1_nwx, c1_wfp, c1_bf, c2_nwx, c2_wfp, c2_bf, head_w, head_b,
    out_ref,
    acc_ref,
):
    nt = pl.program_id(0)                   # node tile  ("parallel")
    et = pl.program_id(1)                   # edge step  ("arbitrary", accumulated)
    tn = acc_ref.shape[0]

    @pl.when(et == 0)
    def _():
        acc_ref[...] = jnp.zeros_like(acc_ref)

    # Only edge tiles that actually hold edges for this node tile do work; the
    # clamped index_map keeps the DMA'd block unchanged on skipped steps.
    @pl.when(et < cnt_ref[nt])
    def _():
        node_col = lax.broadcasted_iota(jnp.int32, (tn, 1), 0) + nt * tn
        onehot_t = (node_col == dst_ref[...]).astype(jnp.bfloat16)      # [TN, TE]
        acc_ref[...] += jnp.dot(onehot_t, h_ref[...],
                                preferred_element_type=jnp.float32)

    @pl.when(et == pl.num_programs(1) - 1)
    def _():
        acc = acc_ref[...]                  # [TN, hpad] f32
        deg = acc[:, 0:1]                   # ones column -> in-degree
        xv = x_ref[...]
        # conv(x)[n] = deg*(x@nwx + nb + eb2@nwe) + (sum_e h)@(ew2@nwe);
        # the (sum_e h) term is read from acc via zero-padded finalize weights.
        x1 = _leaky(deg * (_dot(xv, c1_nwx[...]) + c1_bf[...])
                    + _dot(acc, c1_wfp[...]))
        x2 = _leaky(deg * (_dot(x1, c2_nwx[...]) + c2_bf[...])
                    + _dot(acc, c2_wfp[...]))
        out_ref[...] = _dot(x2, head_w[...]) + head_b[...]


def edge_vgae_encoder(x, edge_index, edge_attr, params, *, tn=512, te=2048):
    x = x.astype(jnp.float32)
    edge_attr = edge_attr.astype(jnp.float32)
    N, d_in = x.shape
    E = edge_index.shape[1]
    de = edge_attr.shape[1]
    H = params["c1_nwe"].shape[0]
    L = params["mu_w"].shape[1]

    hpad = _round_up(2 * H + 1, 128)        # fused (ones|h1|h2) payload width
    outp = _round_up(2 * L, 128)            # fused mu|logvar head width

    # ---- tile sizes -------------------------------------------------------
    # Node tile: multiple of 8 sublanes, capped so >=2 node tiles exist when N
    # allows (so v7x megacore can split the "parallel" node axis).
    n8 = _round_up(N, 8)
    two_tile_cap = _round_up(-(-n8 // 2), 8)
    tn = max(8, min(_round_up(int(tn), 8), n8, two_tile_cap))
    n_pad = _round_up(N, tn)
    n_node_tiles = n_pad // tn

    # Edge tile: multiple of 128 lanes.
    te = max(128, min(_round_up(int(te), 128), _round_up(max(E, 1), 128)))
    e_pad = _round_up(max(E, 1), te)
    e_tiles = e_pad // te

    # ---- sort edges by destination, pad, build per-node-tile tile ranges ---
    dst = edge_index[1].astype(jnp.int32)
    dst_p = jnp.concatenate([dst, jnp.full((e_pad - E,), n_pad, jnp.int32)])
    ea_p = jnp.concatenate(
        [edge_attr, jnp.zeros((e_pad - E, de), jnp.float32)], axis=0)
    order = jnp.argsort(dst_p)              # padded edges (dst=n_pad) sort last
    dst_sorted = dst_p[order]
    ea_sorted = ea_p[order]

    tile_lo = jnp.arange(n_node_tiles, dtype=jnp.int32) * tn
    start = jnp.searchsorted(dst_sorted, tile_lo, side="left").astype(jnp.int32)
    end = jnp.searchsorted(dst_sorted, tile_lo + tn, side="left").astype(jnp.int32)
    has = end > start
    off = jnp.where(has, jnp.minimum(start // te, e_tiles - 1), 0).astype(jnp.int32)
    cnt = jnp.where(has, (end + te - 1) // te - start // te, 0).astype(jnp.int32)

    # Shrink the edge grid axis to the worst-case per-node-tile count when the
    # inputs are concrete; fall back to the static bound under tracing.
    try:
        e_axis = max(1, int(jnp.max(cnt)))
    except Exception:                        # pragma: no cover - traced inputs
        e_axis = max(1, e_tiles)

    # ---- parameter fusion ---------------------------------------------------
    # Edge-MLP weights of both conv layers fused into one [de, hpad] matmul;
    # column 0 is forced to 1.0 through the bias (degree column).
    ew_full = (jnp.zeros((de, hpad), jnp.float32)
               .at[:, 1:H + 1].set(params["c1_ew1"])
               .at[:, H + 1:2 * H + 1].set(params["c2_ew1"]))
    eb_full = (jnp.zeros((1, hpad), jnp.float32)
               .at[:, 0].set(1.0)
               .at[:, 1:H + 1].set(params["c1_eb1"])
               .at[:, H + 1:2 * H + 1].set(params["c2_eb1"]))

    # Linearity rewrite (exact for aggr='add'):
    #   conv(x)[n] = deg[n]*(x[n]@nwx + nb + eb2@nwe) + (sum_e h[e]) @ (ew2@nwe)
    c1_wf = params["c1_ew2"] @ params["c1_nwe"]
    c2_wf = params["c2_ew2"] @ params["c2_nwe"]
    c1_wfp = jnp.zeros((hpad, H), jnp.float32).at[1:H + 1].set(c1_wf)
    c2_wfp = jnp.zeros((hpad, H), jnp.float32).at[H + 1:2 * H + 1].set(c2_wf)
    c1_bf = params["c1_nb"] + params["c1_eb2"] @ params["c1_nwe"]
    c2_bf = params["c2_nb"] + params["c2_eb2"] @ params["c2_nwe"]

    # Fused, lane-dense mu|logvar head.
    head_w = (jnp.zeros((H, outp), jnp.float32)
              .at[:, :L].set(params["mu_w"]).at[:, L:2 * L].set(params["lv_w"]))
    head_b = (jnp.zeros((1, outp), jnp.float32)
              .at[:, :L].set(params["mu_b"]).at[:, L:2 * L].set(params["lv_b"]))

    # ---- pass 1: edge MLP (edge-tiled, independent of node features) -------
    h_full = pl.pallas_call(
        edge_mlp_kernel,
        out_shape=jax.ShapeDtypeStruct((e_pad, hpad), jnp.bfloat16),
        grid=(e_tiles,),
        in_specs=[
            pl.BlockSpec((te, de), lambda i: (i, 0)),
            pl.BlockSpec((de, hpad), lambda i: (0, 0)),
            pl.BlockSpec((1, hpad), lambda i: (0, 0)),
        ],
        out_specs=pl.BlockSpec((te, hpad), lambda i: (i, 0)),
        compiler_params=pltpu.CompilerParams(dimension_semantics=("parallel",)),
    )(ea_sorted, ew_full, eb_full)

    # ---- pass 2: scatter + node update + heads ------------------------------
    x_p = jnp.zeros((n_pad, d_in), jnp.float32).at[:N].set(x)
    dst_2d = dst_sorted.reshape(1, e_pad)

    weights = (params["c1_nwx"], c1_wfp, c1_bf,
               params["c2_nwx"], c2_wfp, c2_bf,
               head_w, head_b)

    def _edge_block(nt_, et_, off_r, cnt_r):
        c = cnt_r[nt_]
        return off_r[nt_] + jnp.minimum(et_, jnp.maximum(c - 1, 0))

    in_specs = [
        pl.BlockSpec((tn, d_in), lambda nt_, et_, off_r, cnt_r: (nt_, 0)),
        pl.BlockSpec((te, hpad),
                     lambda nt_, et_, off_r, cnt_r:
                     (_edge_block(nt_, et_, off_r, cnt_r), 0)),
        pl.BlockSpec((1, te),
                     lambda nt_, et_, off_r, cnt_r:
                     (0, _edge_block(nt_, et_, off_r, cnt_r))),
    ] + [pl.BlockSpec(w.shape, lambda nt_, et_, off_r, cnt_r: (0, 0))
         for w in weights]

    out_specs = pl.BlockSpec((tn, outp), lambda nt_, et_, off_r, cnt_r: (nt_, 0))

    # VMEM budget from the actual tile footprint; cap well below v7x's 64 MiB.
    w_bytes = sum(int(w.size) * 4 for w in weights)
    est = (2 * te * hpad * 2        # h_full tile (bf16), double-buffered
           + 2 * te * 4             # dst tile
           + 2 * tn * d_in * 4      # x tile
           + 2 * tn * outp * 4      # output tile
           + tn * hpad * 4          # resident accumulator
           + tn * te * 6            # one-hot (bf16) + match (bool) temporaries
           + 2 * w_bytes)
    vmem_limit = int(min(48 * 1024 * 1024, max(16 * 1024 * 1024, 2 * est)))

    grid_spec = pltpu.PrefetchScalarGridSpec(
        num_scalar_prefetch=2,
        grid=(n_node_tiles, e_axis),
        in_specs=in_specs,
        out_specs=out_specs,
        scratch_shapes=[pltpu.VMEM((tn, hpad), jnp.float32)],
    )

    out = pl.pallas_call(
        edge_vgae_kernel,
        out_shape=jax.ShapeDtypeStruct((n_pad, outp), jnp.float32),
        grid_spec=grid_spec,
        compiler_params=pltpu.CompilerParams(
            dimension_semantics=("parallel", "arbitrary"),
            vmem_limit_bytes=vmem_limit,
        ),
    )(off, cnt, x_p, h_full, dst_2d, *weights)

    mu = out[:N, :L]
    logvar = out[:N, L:2 * L]
    return mu, logvar


def make_params(key, input_dim, edge_dim, hidden_dim, latent_dim):
    """Deterministic synthetic parameters. Linear weights stored as [in, out]."""
    ks = jax.random.split(key, 20)
    s = 0.1

    def w(k, shape):
        return (s * jax.random.normal(k, shape)).astype(jnp.float32)

    def conv_params(keys, in_dim):
        return {
            "ew1": w(keys[0], (edge_dim, hidden_dim)),
            "eb1": w(keys[1], (1, hidden_dim)),
            "ew2": w(keys[2], (hidden_dim, hidden_dim)),
            "eb2": w(keys[3], (1, hidden_dim)),
            # node_mlp: Linear(in_dim + hidden, hidden), split into x-part / edge-part
            "nwx": w(keys[4], (in_dim, hidden_dim)),
            "nwe": w(keys[5], (hidden_dim, hidden_dim)),
            "nb":  w(keys[6], (1, hidden_dim)),
        }

    c1 = conv_params(ks[0:7], input_dim)
    c2 = conv_params(ks[7:14], hidden_dim)
    params = {f"c1_{k}": v for k, v in c1.items()}
    params.update({f"c2_{k}": v for k, v in c2.items()})
    params["mu_w"] = w(ks[14], (hidden_dim, latent_dim))
    params["mu_b"] = w(ks[15], (1, latent_dim))
    params["lv_w"] = w(ks[16], (hidden_dim, latent_dim))
    params["lv_b"] = w(ks[17], (1, latent_dim))
    return params


def reference_forward(x, edge_index, edge_attr, p):
    """Pure-JAX f32 reference mirroring the PyTorch (eval-mode) semantics."""
    N = x.shape[0]
    dst = edge_index[1]

    def conv(xv, pre):
        h = _leaky(edge_attr @ p[pre + "ew1"] + p[pre + "eb1"])
        edge_emb = h @ p[pre + "ew2"] + p[pre + "eb2"]
        x_i = xv[dst]
        msg = x_i @ p[pre + "nwx"] + edge_emb @ p[pre + "nwe"] + p[pre + "nb"]
        return jax.ops.segment_sum(msg, dst, num_segments=N)

    x1 = _leaky(conv(x, "c1_"))
    x2 = _leaky(conv(x1, "c2_"))
    return x2 @ p["mu_w"] + p["mu_b"], x2 @ p["lv_w"] + p["lv_b"]


if __name__ == "__main__":
    # Small shapes, chosen so the grid has multiple node and edge tiles.
    N, E = 24, 200
    input_dim, edge_dim, hidden_dim, latent_dim = 4, 6, 32, 16

    key = jax.random.PRNGKey(0)
    kx, ke, ki, kp = jax.random.split(key, 4)

    x = jax.random.normal(kx, (N, input_dim), dtype=jnp.float32)
    edge_attr = jax.random.normal(ke, (E, edge_dim), dtype=jnp.float32)
    edge_index = jax.random.randint(ki, (2, E), 0, N, dtype=jnp.int32)

    params = make_params(kp, input_dim, edge_dim, hidden_dim, latent_dim)
    mu_ref, lv_ref = reference_forward(x, edge_attr=edge_attr,
                                       edge_index=edge_index, p=params)

    # Multi-tile path: 3 node tiles x 2 edge tiles (exercises the clamped,
    # data-dependent edge index map and the pl.when tile skip).
    mu, logvar = edge_vgae_encoder(x, edge_index, edge_attr, params, tn=8, te=128)
    jax.block_until_ready((mu, logvar))
    assert mu.shape == (N, latent_dim) and logvar.shape == (N, latent_dim)
    # bf16 scatter operands (f32 accumulation) -> slightly relaxed tolerance.
    assert jnp.allclose(mu, mu_ref, rtol=5e-2, atol=5e-2)
    assert jnp.allclose(logvar, lv_ref, rtol=5e-2, atol=5e-2)

    # Default path (node axis auto-split into 2 "parallel" tiles).
    mu2, logvar2 = edge_vgae_encoder(x, edge_index, edge_attr, params)
    jax.block_until_ready((mu2, logvar2))
    assert jnp.allclose(mu2, mu_ref, rtol=5e-2, atol=5e-2)
    assert jnp.allclose(logvar2, lv_ref, rtol=5e-2, atol=5e-2)

    print("KERNEL_OK")
</pallas_src>

<mosaic_0001>
module attributes {stable_mosaic.version = 11 : i64} {
  func.func @edge_mlp_kernel(%arg0: i32, %arg1: memref<128x6xf32, #tpu.memory_space<vmem>>, %arg2: memref<6x128xf32, #tpu.memory_space<vmem>>, %arg3: memref<1x128xf32, #tpu.memory_space<vmem>>, %arg4: memref<128x128xbf16, #tpu.memory_space<vmem>>) attributes {dimension_semantics = [#tpu.dimension_semantics<parallel>], iteration_bounds = array<i64: 2>, scalar_prefetch = 0 : i64, scratch_operands = 0 : i64, tpu.core_type = #tpu.core_type<tc>, window_params = [{transform_indices = @transform_0, window_bounds = array<i64: 128, 6>}, {pipeline_mode = #tpu.pipeline_mode<synchronous>, transform_indices = @transform_1, window_bounds = array<i64: 6, 128>}, {pipeline_mode = #tpu.pipeline_mode<synchronous>, transform_indices = @transform_2, window_bounds = array<i64: 1, 128>}, {transform_indices = @transform_3, window_bounds = array<i64: 128, 128>}]} {
    %c0 = arith.constant 0 : index
    %c0_0 = arith.constant 0 : index
    %0 = vector.load %arg1[%c0, %c0_0] : memref<128x6xf32, #tpu.memory_space<vmem>>, vector<128x6xf32>
    %c0_1 = arith.constant 0 : index
    %c0_2 = arith.constant 0 : index
    %1 = vector.load %arg2[%c0_1, %c0_2] : memref<6x128xf32, #tpu.memory_space<vmem>>, vector<6x128xf32>
    %cst = arith.constant dense<0.000000e+00> : vector<128x128xf32>
    %2 = tpu.matmul %0, %1, %cst {dimension_numbers = #tpu.dot_dimension_numbers<[1], [0], [0], [1], [0, 0, 1, 1], [], []>} : vector<128x6xf32>, vector<6x128xf32>, vector<128x128xf32> -> vector<128x128xf32>
    %c0_3 = arith.constant 0 : index
    %c0_4 = arith.constant 0 : index
    %3 = vector.load %arg3[%c0_3, %c0_4] : memref<1x128xf32, #tpu.memory_space<vmem>>, vector<1x128xf32>
    %4 = vector.broadcast %3 : vector<1x128xf32> to vector<128x128xf32>
    %5 = arith.addf %2, %4 : vector<128x128xf32>
    %cst_5 = arith.constant 0.000000e+00 : f32
    %6 = vector.broadcast %cst_5 : f32 to vector<128x128xf32>
    %7 = arith.cmpf ogt, %5, %6 : vector<128x128xf32>
    %cst_6 = arith.constant 1.500000e-01 : f32
    %8 = vector.broadcast %cst_6 : f32 to vector<128x128xf32>
    %9 = arith.mulf %8, %5 : vector<128x128xf32>
    %10 = arith.select %7, %5, %9 : vector<128x128xi1>, vector<128x128xf32>
    %11 = arith.truncf %10 : vector<128x128xf32> to vector<128x128xbf16>
    %c0_7 = arith.constant 0 : index
    %c0_8 = arith.constant 0 : index
    %12 = vector.load %arg4[%c0_7, %c0_8] : memref<128x128xbf16, #tpu.memory_space<vmem>>, vector<128x128xbf16>
    tpu.vector_store %arg4[%c0_7, %c0_8], %11 {strides = array<i32>} : memref<128x128xbf16, #tpu.memory_space<vmem>>, vector<128x128xbf16>,
    return
  }
  func.func @transform_0(%arg0: i32) -> (i32, i32) {
    %c0_i32 = arith.constant 0 : i32
    %c0_i32_0 = arith.constant 0 : i32
    return %arg0, %c0_i32 : i32, i32
  }
  func.func @transform_1(%arg0: i32) -> (i32, i32) {
    %c0_i32 = arith.constant 0 : i32
    %c0_i32_0 = arith.constant 0 : i32
    %c0_i32_1 = arith.constant 0 : i32
    return %c0_i32, %c0_i32_0 : i32, i32
  }
  func.func @transform_2(%arg0: i32) -> (i32, i32) {
    %c0_i32 = arith.constant 0 : i32
    %c0_i32_0 = arith.constant 0 : i32
    %c0_i32_1 = arith.constant 0 : i32
    return %c0_i32, %c0_i32_0 : i32, i32
  }
  func.func @transform_3(%arg0: i32) -> (i32, i32) {
    %c0_i32 = arith.constant 0 : i32
    %c0_i32_0 = arith.constant 0 : i32
    return %arg0, %c0_i32 : i32, i32
  }
}

</mosaic_0001>

<bundles_post_ra>
// kernel: tpu_custom_call.1
= control target key start
LH: loop header
LB: loop body
LE: loop exit
PB: predicated region body
PF: predicated region fallthrough
CT: control target
= control target key end

     0   :  { %8 = vsyncpa [#allocation3], 0  ;;  %s1038_s0 = inlined_call_operand.vmem [shape: f32[256,6], index: 0, kind: input, shape index: {}]   ;;  %s1039_s1 = inlined_call_operand.vmem [shape: f32[6,128], index: 1, kind: input, shape index: {}]   ;;  %s1040_s2 = inlined_call_operand.vmem [shape: f32[1,128], index: 2, kind: input, shape index: {}]   ;;  %s1041_s3 = inlined_call_operand.hbm [shape: bf16[256,128], index: 3, kind: output, shape index: {}]  }
   0x1   :  { %10 = vsyncpa [#allocation3 + $0x1], 0  ;;  %s881_s12 = smov 0   ;;  %s883_s13 = smov 0  }
   0x2   :  { %s885_s14 = smov 0   ;;  %s887_s15 = smov 0  }
   0x3 LB: > { %s902_s16 = sadd.s32 4294967295, %s856_s15   ;;  %s598_s17 = sadd.s32 4294967294, %s856_s15   ;;  %s856_s15 = sphi %s887_s15, %s1047_s15   ;;  %s852_s14 = sphi %s885_s14, %s1046_s14   ;;  %s848_s13 = sphi %s883_s13, %s1045_s13   ;;  %s844_s12 = sphi %s881_s12, %s1044_s12  }
   0x4   : > { %s906_s18 = sadd.s32 1, %s856_s15   ;;  %s91_s19 = sadd.s32 1, %s852_s14 }
   0x5   : > { %s88_s20 = ssub.s32 %s856_s15, %s906_s18  ;;  %p101_p0 = scmp.ne.s32.totalorder %s852_s14, %s848_s13 }
   0x6   : > { %p89_p1 = scmp.eq.s32.totalorder %s88_s20, 0  ;;  %p102_p2 = scmp.eq.s32.totalorder %s902_s16, 1 }
   0x7   : > { %p107_p3 = scmp.ne.s32.totalorder %s848_s13, %s844_s12  ;;  %p108_p4 = scmp.eq.s32.totalorder %s598_s17, 1 }
   0x8   : > { %s917_s21 = scalar_select %p89_p1, %s852_s14, %s91_s19  }
   0x9   : > { %p919_p5 = por %p102_p2, %p101_p0  ;;  %p923_p6 = por %p108_p4, %p107_p3 }
   0xa   : > { %p601_p7 = scmp.ge.s32.totalorder %s856_s15, 1  ;;  %p141_p8 = scmp.lt.s32.totalorder %s856_s15, 3 }
   0xc   : > { %p142_p9 = pnand %p601_p7, %p141_p8 }
   0xd   : > { %v188_v0 = vld [vmem:[%s1039_s1] sm:$0x3f] (!%p142_p9)  ;;  %vm245_vm0 = vcmask (!%p142_p9), 1045504   ;;  %s603_s26 = sshll.u32 (!%p142_p9), %s902_s16, 4  ;;  %vm196_vm1 = vcmask (!%p142_p9), 48128   ;;  %s162_s6 = sand.u32 (!%p142_p9), 1, %s848_s13  }
   0xe   : > { %145 = sbr.rel (%p142_p9) target bundleno = 276 (0x114), region = 32  ;;  %725 = vmatprep.subr.msk.mxu0 (!%p142_p9), %vm245_vm0, %v188_v0  ;;  %751 = vmatprep.subr.msk.mxu1 (!%p142_p9), %vm245_vm0, %v188_v0  ;;  %p166_p10 = scmp.lt.s32.totalorder (!%p142_p9), %s603_s26, 31  ;;  %v955_v17 = vld [vmem:[%s1040_s2] ss:$0 sm:$0xff] (!%p142_p9) }
   0xf   : > { %726 = vmatpush3.msk.msra.mxu0 (!%p142_p9), %vm245_vm0, %v188_v0  ;;  %752 = vmatpush3.msk.msra.mxu1 (!%p142_p9), %vm245_vm0, %v188_v0  ;;  %s602_s7 = sshll.u32 (!%p142_p9), %s162_s6, 6  ;;  %s660_s9 = sshll.u32 (!%p142_p9), %s902_s16, 10 }
  0x10   : > { %s968_s8 = scalar_lea.vmem (!%p142_p9), [#allocation2], %s602_s7  ;;  %s989_s17 = scalar_lea.hbm (!%p142_p9), %s1041_s3, %s660_s9 }
  0x11   : > { %s536_s10 = sshll.u32 (!%p142_p9), %s968_s8, 4  ;;  %s997_s19 = scalar_lea.sflag (!%p142_p9), [#allocation3], %s162_s6  ;;  %s991_s10 = int_to_ptr.vmem [resolvable:$true] %s536_s10 }
  0x12   : > { %s794_s20 = scalar_lea.vmem (!%p142_p9), %s991_s10, 1024  ;;  %s858_s24 = smov (!%p142_p9), [#allocation2]  }
  0x13   : > { %p795_p11 = scmp.ne.s32.totalorder (!%p142_p9), %s991_s10, %s794_s20  ;;  %s798_s25 = sshll.u32 (!%p142_p9), %s858_s24, 4  ;;  %s799_s25 = int_to_ptr.vmem [resolvable:$false] %s798_s25 }
  0x14   : > { %p801_p0 = scmp.lt.s32.totalorder (!%p142_p9), %s991_s10, %s799_s25 }
  0x15   : > { %s1049_s26 = smov (!%p166_p10, %s603_s26), 31  ;;  %p796_p12 = pnand %p795_p11, %p919_p5 }
  0x16   : > { %s604_s27 = sshll.u32 %s1049_s26, 3  ;;  %s800_s26 = scalar_lea.vmem %s799_s25, 2048 }
  0x17   : > { %s169_s30 = scalar_lea.vmem %s1038_s0, %s604_s27  ;;  %p797_p13 = pneg %p796_p12 }
  0x18   : > { %v172_v1 = vld [vmem:[%s169_s30] sm:$0xff]  ;;  %v173_v3 = vld [vmem:[%s169_s30 + $0x8] sm:$0xff]  ;;  %v174_v5 = vld [vmem:[%s169_s30 + $0x10] sm:$0xff]  ;;  %p802_p1 = scmp.lt.s32.totalorder %s800_s26, %s794_s20 }
  0x19   : > { %v180_v2 = vld [vmem:[%s169_s30 + $0x40] sm:$0xff]  ;;  %727 = vmatprep.mubr.msk.f32.mxu0 %vm196_vm1, %v172_v1  ;;  %v181_v4 = vld [vmem:[%s169_s30 + $0x48] sm:$0xff]  ;;  %v182_v6 = vld [vmem:[%s169_s30 + $0x50] sm:$0xff] }
  0x1a   : > { %739 = vmatprep.mubr.msk.f32.mxu1 %vm196_vm1, %v180_v2  ;;  %728 = vmatmul.mubr.msk.f32.vlgmr.msra.gmra.mrb[0].mxu0 %vm196_vm1, %v173_v3  ;;  %v175_v7 = vld [vmem:[%s169_s30 + $0x18] sm:$0xff]  ;;  %v176_v9 = vld [vmem:[%s169_s30 + $0x20] sm:$0xff]  ;;  %v177_v11 = vld [vmem:[%s169_s30 + $0x28] sm:$0xff]  ;;  %p803_p2 = por %p802_p1, %p801_p0 }
  0x1b   : > { %740 = vmatmul.mubr.msk.f32.vlgmr.msra.gmra.mrb[0].mxu1 %vm196_vm1, %v181_v4  ;;  %730 = vmatprep.mubr.msk.f32.mxu0 %vm196_vm1, %v174_v5  ;;  %v183_v8 = vld [vmem:[%s169_s30 + $0x58] sm:$0xff]  ;;  %v184_v10 = vld [vmem:[%s169_s30 + $0x60] sm:$0xff]  ;;  %v185_v12 = vld [vmem:[%s169_s30 + $0x68] sm:$0xff] }
  0x1c   : > { %742 = vmatprep.mubr.msk.f32.mxu1 %vm196_vm1, %v182_v6  ;;  %v178_v13 = vld [vmem:[%s169_s30 + $0x30] sm:$0xff]  ;;  %v179_v15 = vld [vmem:[%s169_s30 + $0x38] sm:$0xff]  ;;  %p804_p3 = pnand %p803_p2, %p797_p13 }
  0x1d   : > { %v186_v14 = vld [vmem:[%s169_s30 + $0x70] sm:$0xff]  ;;  %v187_v16 = vld [vmem:[%s169_s30 + $0x78] sm:$0xff] }
  0x1e   : > { %731 = vmatmul.mubr.msk.f32.gmra.mrb[2].mxu0 %vm196_vm1, %v175_v7 }
  0x1f   : > { %743 = vmatmul.mubr.msk.f32.gmra.mrb[2].mxu1 %vm196_vm1, %v183_v8  ;;  %733 = vmatprep.mubr.msk.f32.mxu0 %vm196_vm1, %v176_v9 }
  0x20   : > { %745 = vmatprep.mubr.msk.f32.mxu1 %vm196_vm1, %v184_v10 }
  0x22   : > { %734 = vmatmul.mubr.msk.f32.gmra.mrb[4].mxu0 %vm196_vm1, %v177_v11 }
  0x23   : > { %746 = vmatmul.mubr.msk.f32.gmra.mrb[4].mxu1 %vm196_vm1, %v185_v12  ;;  %736 = vmatprep.mubr.msk.f32.mxu0 %vm196_vm1, %v178_v13 }
  0x24   : > { %748 = vmatprep.mubr.msk.f32.mxu1 %vm196_vm1, %v186_v14 }
  0x26   : > { %737 = vmatmul.mubr.msk.f32.gmra.mrb[6].mxu0 %vm196_vm1, %v179_v15 }
  0x27   : > { %749 = vmatmul.mubr.msk.f32.gmra.mrb[6].mxu1 %vm196_vm1, %v187_v16 }
  0xed   : > { %v729_v18 = vpop.f32.mrb[0].mxu0 }
  0xee   : > { %v741_v19 = vpop.f32.mrb[0].mxu1  ;;  %v321_v20 = vadd.f32 %v729_v18, %v955_v17  ;;  %v315_v22 = vpop.f32.mrb[1].mxu0 }
  0xef   : > { %v361_v21 = vadd.f32 %v741_v19, %v955_v17  ;;  %v355_v23 = vpop.f32.mrb[1].mxu1  ;;  %v316_v24 = vadd.f32 %v955_v17, %v315_v22 }
  0xf0   : > { %v356_v25 = vadd.f32 %v955_v17, %v355_v23  ;;  %vm395_vm2 = vcmp.gt.f32.partialorder %v321_v20, 0.0  ;;  %v411_v26 = vmul.f32 0.15, %v321_v20 }
  0xf1   : > { %vm403_vm3 = vcmp.gt.f32.partialorder %v361_v21, 0.0  ;;  %v419_v27 = vmul.f32 0.15, %v361_v21  ;;  %vm394_vm4 = vcmp.gt.f32.partialorder %v316_v24, 0.0  ;;  %v410_v28 = vmul.f32 0.15, %v316_v24 }
  0xf2   : > { %vm402_vm5 = vcmp.gt.f32.partialorder %v356_v25, 0.0  ;;  %v418_v29 = vmul.f32 0.15, %v356_v25  ;;  %v427_v30 = vsel %vm395_vm2, %v321_v20, %v411_v26  ;;  %v732_v32 = vpop.f32.mrb[2].mxu0  ;;  %v744_v33 = vpop.f32.mrb[2].mxu1 }
  0xf3   : > { %v435_v31 = vsel %vm403_vm3, %v361_v21, %v419_v27  ;;  %v426_v34 = vsel %vm394_vm4, %v316_v24, %v410_v28  ;;  %v331_v36 = vadd.f32 %v732_v32, %v955_v17  ;;  %v371_v37 = vadd.f32 %v744_v33, %v955_v17  ;;  %v325_v38 = vpop.f32.mrb[3].mxu0  ;;  %v365_v39 = vpop.f32.mrb[3].mxu1 }
  0xf4   : > { %v434_v35 = vsel %vm402_vm5, %v356_v25, %v418_v29  ;;  %v664_v40 = vpack.c.bf16 %v427_v30, %v426_v34  ;;  %v326_v42 = vadd.f32 %v955_v17, %v325_v38  ;;  %v366_v43 = vadd.f32 %v955_v17, %v365_v39 }
  0xf5   : > { %v684_v41 = vpack.c.bf16 %v435_v31, %v434_v35  ;;  %vm397_vm6 = vcmp.gt.f32.partialorder %v331_v36, 0.0  ;;  %v413_v44 = vmul.f32 0.15, %v331_v36  ;;  %vm405_vm7 = vcmp.gt.f32.partialorder %v371_v37, 0.0  ;;  %v735_v50 = vpop.f32.mrb[4].mxu0 }
  0xf6   : > { %v421_v45 = vmul.f32 0.15, %v371_v37  ;;  %665 = vst [vmem:[%s968_s8] sm:$0xff] %v664_v40   ;;  %vm396_vm8 = vcmp.gt.f32.partialorder %v326_v42, 0.0  ;;  %v412_v46 = vmul.f32 0.15, %v326_v42  ;;  %vm404_vm9 = vcmp.gt.f32.partialorder %v366_v43, 0.0 }
  0xf7   : > { %704 = vst [vmem:[%s968_s8 + $0x20] sm:$0xff] %v684_v41   ;;  %v420_v47 = vmul.f32 0.15, %v366_v43  ;;  %v429_v48 = vsel %vm397_vm6, %v331_v36, %v413_v44  ;;  %v747_v51 = vpop.f32.mrb[4].mxu1  ;;  %v341_v54 = vadd.f32 %v735_v50, %v955_v17  ;;  %v335_v56 = vpop.f32.mrb[5].mxu0 }
  0xf8   : > { %v437_v49 = vsel %vm405_vm7, %v371_v37, %v421_v45  ;;  %v428_v52 = vsel %vm396_vm8, %v326_v42, %v412_v46  ;;  %v381_v55 = vadd.f32 %v747_v51, %v955_v17  ;;  %v375_v57 = vpop.f32.mrb[5].mxu1  ;;  %v336_v60 = vadd.f32 %v955_v17, %v335_v56 }
  0xf9   : > { %v436_v53 = vsel %vm404_vm9, %v366_v43, %v420_v47  ;;  %v669_v58 = vpack.c.bf16 %v429_v48, %v428_v52  ;;  %v376_v61 = vadd.f32 %v955_v17, %v375_v57  ;;  %v738_v62 = vpop.f32.mrb[6].mxu0  ;;  %vm399_vm10 = vcmp.gt.f32.partialorder %v341_v54, 0.0 }
  0xfa   : > { %v689_v59 = vpack.c.bf16 %v437_v49, %v436_v53  ;;  %v750_v63 = vpop.f32.mrb[6].mxu1  ;;  %v415_v0 = vmul.f32 0.15, %v341_v54  ;;  %vm407_vm11 = vcmp.gt.f32.partialorder %v381_v55, 0.0  ;;  %v423_v1 = vmul.f32 0.15, %v381_v55 }
  0xfb   : > { %701 = vst [vmem:[%s968_s8 + $0x8] sm:$0xff] %v669_v58   ;;  %vm398_vm12 = vcmp.gt.f32.partialorder %v336_v60, 0.0  ;;  %v414_v2 = vmul.f32 0.15, %v336_v60  ;;  %vm406_vm13 = vcmp.gt.f32.partialorder %v376_v61, 0.0  ;;  %v351_v6 = vadd.f32 %v738_v62, %v955_v17  ;;  %v345_v8 = vpop.f32.mrb[7].mxu0 }
  0xfc   : > { %705 = vst [vmem:[%s968_s8 + $0x28] sm:$0xff] %v689_v59   ;;  %v422_v3 = vmul.f32 0.15, %v376_v61  ;;  %v431_v4 = vsel %vm399_vm10, %v341_v54, %v415_v0  ;;  %v439_v5 = vsel %vm407_vm11, %v381_v55, %v423_v1  ;;  %v391_v7 = vadd.f32 %v750_v63, %v955_v17  ;;  %v385_v9 = vpop.f32.mrb[7].mxu1 }
  0xfd   : > { %v430_v10 = vsel %vm398_vm12, %v336_v60, %v414_v2  ;;  %v346_v12 = vadd.f32 %v955_v17, %v345_v8  ;;  %v386_v13 = vadd.f32 %v955_v17, %v385_v9  ;;  %vm401_vm14 = vcmp.gt.f32.partialorder %v351_v6, 0.0 }
  0xfe   : > { %v438_v11 = vsel %vm406_vm13, %v376_v61, %v422_v3  ;;  %v674_v14 = vpack.c.bf16 %v431_v4, %v430_v10  ;;  %v417_v16 = vmul.f32 0.15, %v351_v6  ;;  %vm409_vm15 = vcmp.gt.f32.partialorder %v391_v7, 0.0 }
  0xff   : > { %v694_v15 = vpack.c.bf16 %v439_v5, %v438_v11  ;;  %v425_v18 = vmul.f32 0.15, %v391_v7  ;;  %vm400_vm0 = vcmp.gt.f32.partialorder %v346_v12, 0.0  ;;  %v416_v19 = vmul.f32 0.15, %v346_v12 }
 0x100   : > { %702 = vst [vmem:[%s968_s8 + $0x10] sm:$0xff] %v674_v14   ;;  %v433_v20 = vsel %vm401_vm14, %v351_v6, %v417_v16  ;;  %vm408_vm1 = vcmp.gt.f32.partialorder %v386_v13, 0.0  ;;  %v424_v21 = vmul.f32 0.15, %v386_v13 }
 0x101   : > { %706 = vst [vmem:[%s968_s8 + $0x30] sm:$0xff] %v694_v15   ;;  %v441_v17 = vsel %vm409_vm15, %v391_v7, %v425_v18  ;;  %v432_v22 = vsel %vm400_vm0, %v346_v12, %v416_v19 }
 0x102   : > { %v679_v23 = vpack.c.bf16 %v433_v20, %v432_v22  ;;  %v440_v24 = vsel %vm408_vm1, %v386_v13, %v424_v21 }
 0x103   : > { %v699_v25 = vpack.c.bf16 %v441_v17, %v440_v24 }
 0x104   : > { %703 = vst [vmem:[%s968_s8 + $0x18] sm:$0xff] %v679_v23  }
 0x105   : > { %707 = vst [vmem:[%s968_s8 + $0x38] sm:$0xff] %v699_v25  }
 0x106   : > { %807 = shalt.err (!%p804_p3)
}
 0x107   : > { %s808_s27 = scalar_lea.hbm %s989_s17, 1024  ;;  %s812_s30 = scalar_lea.hbm %s1041_s3, 2048 }
 0x108   : > { %p809_p4 = scmp.ne.s32.totalorder %s989_s17, %s808_s27  ;;  %p813_p9 = scmp.lt.u32.totalorder %s989_s17, %s1041_s3 }
 0x109   : > { %p814_p10 = scmp.lt.u32.totalorder %s812_s30, %s808_s27  ;;  %p816_p12 = scmp.lt.u32.totalorder %s808_s27, %s989_s17 }
 0x10a   : > { %p810_p7 = pnand %p809_p4, %p919_p5 }
 0x10b   : > { %p815_p11 = por %p814_p10, %p813_p9 }
 0x10c   : > { %p811_p8 = pneg %p810_p7 }
 0x10d   : > { %p817_p13 = por %p816_p12, %p815_p11 }
 0x10f   : > { %p818_p0 = pnand %p817_p13, %p811_p8 }
 0x111   : > { %821 = shalt.err (!%p818_p0)
}
 0x112   : > { %s859_s6 = smov 64   ;;  %s860_s7 = smov 4  }
 0x113   : > { %753 = dma.vmem_to_hbm [thread:$0]  (%p919_p5), %s991_s10, 1024, %s989_s17, %s997_s19, %s859_s6, %s859_s6, %s860_s7  }
 0x114 PF: > { %p759_p1 = scmp.ge.s32.totalorder %s856_s15, 2  ;;  %s551_s8 = sand.u32 1, %s844_s12  }
 0x115   : > { %s552_s9 = scalar_lea.sflag [#allocation3], %s551_s8 }
 0x116   : > { %p756_p2 = pnand %p759_p1, %p923_p6 }
 0x118   : > { %839 = dma.done.wait (!%p756_p2), %s552_s9, 1024  }
 0x119   : > { %841 = vsyncadd (!%p756_p2), %s552_s9, 4294966272  ;;  %p13_p3 = scmp.ge.s32.totalorder %s906_s18, 4   ;;  %s1044_s12 = smov %s848_s13 }
 0x11a   : > { %s1045_s13 = smov %s852_s14  ;;  %s1046_s14 = smov %s917_s21 }
 0x11b   : > { %s1047_s15 = smov %s906_s18  ;;  %15 = sbr.rel (!%p13_p3) target bundleno = 3 (0x3), region = 67 }
 0x122   :  { %557 = vsyncpa [#allocation3], 1 }
 0x123   :  { %559 = vsyncpa [#allocation3 + $0x1], 1 }

</bundles_post_ra>
